<compile_context>
chip_gen: v7x
topology: tpu7x:2x2x1
jax: 0.10.0
libtpu: 0.0.40
codegen_flags: <defaults>
</compile_context>

<pallas_src>
import functools

import jax
import jax.numpy as jnp
from jax.experimental import pallas as pl
from jax.experimental.pallas import tpu as pltpu


def _round_up(x, m):
    return (x + m - 1) // m * m


# ---------------------------------------------------------------------------
# Pallas kernel: out = softplus_mask(x @ W + b)
# ---------------------------------------------------------------------------
def _make_linreg_kernel(positive_eng, positive_pos):
    """Fused GEMM + bias + (column-masked) softplus."""

    def kernel(x_ref, w_ref, b_ref, o_ref):
        # bf16 operands, f32 accumulation on the MXU.
        acc = jnp.dot(x_ref[...], w_ref[...],
                      preferred_element_type=jnp.float32)
        acc = acc + b_ref[...]                       # (1, Np) broadcasts over M

        # numerically-stable softplus: max(x,0) + log1p(exp(-|x|))
        sp = jnp.maximum(acc, 0.0) + jnp.log1p(jnp.exp(-jnp.abs(acc)))

        if positive_eng and positive_pos:
            out = sp                                  # softplus on every column
        elif not positive_eng and not positive_pos:
            out = acc
        else:
            col = jax.lax.broadcasted_iota(jnp.int32, acc.shape, 1)
            mask = (col == 0) if positive_eng else (col >= 1)
            out = jnp.where(mask, sp, acc)
        o_ref[...] = out

    return kernel


# ---------------------------------------------------------------------------
# Parameter preparation (done once, NOT per forward pass)
# ---------------------------------------------------------------------------
def prepare_params(w, b):
    """w: (out_features, in_features) f32, b: (out_features,) f32.

    Returns the transposed, zero-padded, bf16 weight (Kp, Np) and the
    zero-padded f32 bias (1, Np), both tile-aligned for the kernel.
    """
    n_out, k = w.shape
    kp, np_ = _round_up(k, 128), _round_up(n_out, 128)
    w_p = jnp.zeros((kp, np_), jnp.bfloat16).at[:k, :n_out].set(
        w.T.astype(jnp.bfloat16))
    b_p = jnp.zeros((1, np_), jnp.float32).at[0, :n_out].set(
        b.astype(jnp.float32))
    return w_p, b_p


# ---------------------------------------------------------------------------
# Forward pass
# ---------------------------------------------------------------------------
@functools.partial(jax.jit,
                   static_argnames=("n_out", "positive_eng", "positive_pos"))
def linreg_forward(x, w_p, b_p, n_out=3, positive_eng=True, positive_pos=True):
    batch = x.shape[0]
    x2 = x.reshape(batch, -1).astype(jnp.float32)     # x.view(B, H*W)
    k = x2.shape[1]
    kp, np_ = w_p.shape
    mp = _round_up(max(batch, 1), 16)                 # bf16 sublane packing (16x128)

    # Only the (tiny) activation is padded per call; weights are pre-padded.
    a_p = jnp.zeros((mp, kp), jnp.bfloat16).at[:batch, :k].set(
        x2.astype(jnp.bfloat16))

    kernel = _make_linreg_kernel(positive_eng, positive_pos)
    out = pl.pallas_call(
        kernel,
        out_shape=jax.ShapeDtypeStruct((mp, np_), jnp.float32),
        in_specs=[pl.BlockSpec(memory_space=pltpu.MemorySpace.VMEM)] * 3,
        out_specs=pl.BlockSpec(memory_space=pltpu.MemorySpace.VMEM),
    )(a_p, w_p, b_p)
    return out[:batch, :n_out]


# ---------------------------------------------------------------------------
# Main
# ---------------------------------------------------------------------------
if __name__ == "__main__":
    key = jax.random.PRNGKey(0)
    wkey, bkey, xkey = jax.random.split(key, 3)

    H = W = 15
    in_features = H * W            # 225
    n_out = 3
    batch = 2

    # nn.Linear(225, 3) default init: U(-1/sqrt(fan_in), 1/sqrt(fan_in))
    bound = 1.0 / (in_features ** 0.5)
    w = jax.random.uniform(wkey, (n_out, in_features), jnp.float32,
                           minval=-bound, maxval=bound)
    b = jax.random.uniform(bkey, (n_out,), jnp.float32,
                           minval=-bound, maxval=bound)
    w_p, b_p = prepare_params(w, b)

    # input gets viewed to (B, H*W) inside the forward, like the PyTorch model
    x = jax.random.normal(xkey, (batch, 1, H, W), jnp.float32)

    out = linreg_forward(x, w_p, b_p, n_out=n_out,
                         positive_eng=True, positive_pos=True)
    out = jax.block_until_ready(out)

    assert out.shape == (batch, n_out)
    assert bool(jnp.all(out >= 0.0))   # softplus output is strictly positive

    # plain-JAX f32 reference (tolerance covers the bf16 GEMM operands)
    ref = x.reshape(batch, -1) @ w.T + b
    ref = jnp.maximum(ref, 0.0) + jnp.log1p(jnp.exp(-jnp.abs(ref)))
    assert bool(jnp.allclose(out, ref, atol=2e-2, rtol=2e-2))

    # TODO(synk): CustomSoftplusFunction.backward (custom autograd) is not
    # translated; only the forward pass is implemented here.
    print("KERNEL_OK")
</pallas_src>

<mosaic_0001>
module attributes {stable_mosaic.version = 11 : i64} {
  func.func @kernel(%arg0: memref<16x256xbf16, #tpu.memory_space<vmem>>, %arg1: memref<256x128xbf16, #tpu.memory_space<vmem>>, %arg2: memref<1x128xf32, #tpu.memory_space<vmem>>, %arg3: memref<16x128xf32, #tpu.memory_space<vmem>>) attributes {dimension_semantics = [], scalar_prefetch = 0 : i64, scratch_operands = 0 : i64, tpu.core_type = #tpu.core_type<tc>} {
    %c0 = arith.constant 0 : index
    %c0_0 = arith.constant 0 : index
    %0 = vector.load %arg0[%c0, %c0_0] : memref<16x256xbf16, #tpu.memory_space<vmem>>, vector<16x256xbf16>
    %c0_1 = arith.constant 0 : index
    %c0_2 = arith.constant 0 : index
    %1 = vector.load %arg1[%c0_1, %c0_2] : memref<256x128xbf16, #tpu.memory_space<vmem>>, vector<256x128xbf16>
    %cst = arith.constant dense<0.000000e+00> : vector<16x128xf32>
    %2 = tpu.matmul %0, %1, %cst {dimension_numbers = #tpu.dot_dimension_numbers<[1], [0], [0], [1], [0, 0, 1, 1], [], []>} : vector<16x256xbf16>, vector<256x128xbf16>, vector<16x128xf32> -> vector<16x128xf32>
    %c0_3 = arith.constant 0 : index
    %c0_4 = arith.constant 0 : index
    %3 = vector.load %arg2[%c0_3, %c0_4] : memref<1x128xf32, #tpu.memory_space<vmem>>, vector<1x128xf32>
    %4 = vector.broadcast %3 : vector<1x128xf32> to vector<16x128xf32>
    %5 = arith.addf %2, %4 : vector<16x128xf32>
    %cst_5 = arith.constant 0.000000e+00 : f32
    %6 = vector.broadcast %cst_5 : f32 to vector<16x128xf32>
    %7 = arith.maximumf %5, %6 : vector<16x128xf32>
    %8 = math.absf %5 : vector<16x128xf32>
    %cst_6 = arith.constant 0.000000e+00 : f32
    %9 = vector.broadcast %cst_6 : f32 to vector<16x128xf32>
    %10 = arith.subf %9, %8 : vector<16x128xf32>
    %11 = math.exp %10 : vector<16x128xf32>
    %12 = math.log1p %11 : vector<16x128xf32>
    %13 = arith.addf %7, %12 : vector<16x128xf32>
    %c0_7 = arith.constant 0 : index
    %c0_8 = arith.constant 0 : index
    %14 = vector.load %arg3[%c0_7, %c0_8] : memref<16x128xf32, #tpu.memory_space<vmem>>, vector<16x128xf32>
    tpu.vector_store %arg3[%c0_7, %c0_8], %13 {strides = array<i32>} : memref<16x128xf32, #tpu.memory_space<vmem>>, vector<16x128xf32>,
    return
  }
}

</mosaic_0001>

<bundles_post_ra>
// kernel: linreg_forward.1
= control target key start
LH: loop header
LB: loop body
LE: loop exit
PB: predicated region body
PF: predicated region fallthrough
CT: control target
= control target key end

     0   :  { %8 = vsyncpa [#allocation3], 0  ;;  %s349_s12 = smov [#allocation2]   ;;  %s399_s0 = inlined_call_operand.vmem [shape: bf16[16,256], index: 0, kind: input, shape index: {}]   ;;  %s400_s1 = inlined_call_operand.hbm [shape: bf16[256,128], index: 1, kind: input, shape index: {}]   ;;  %s401_s2 = inlined_call_operand.vmem [shape: f32[1,128], index: 2, kind: input, shape index: {}]   ;;  %s402_s3 = inlined_call_operand.vmem [shape: f32[16,128], index: 3, kind: output, shape index: {}]  }
   0x1   :  { %s16_s13 = sshll.u32 %s349_s12, 4  ;;  %s325_s16 = scalar_lea.hbm %s400_s1, 2048  ;;  %s17_s13 = int_to_ptr.vmem [resolvable:$true] %s16_s13 }
   0x2   :  { %p326_p0 = scmp.ne.s32.totalorder %s400_s1, %s325_s16  ;;  %p329_p1 = scmp.lt.u32.totalorder %s325_s16, %s400_s1 }
   0x4   :  { %p331_p2 = pnand %p329_p1, %p326_p0 }
   0x6   :  { %334 = shalt.err (!%p331_p2)
}
   0x7   :  { %s335_s21 = scalar_lea.vmem %s17_s13, 2048  ;;  %p340_p4 = scmp.lt.s32.totalorder %s17_s13, %s17_s13 }
   0x8   :  { %p336_p3 = scmp.ne.s32.totalorder %s17_s13, %s335_s21  ;;  %p341_p5 = scmp.lt.s32.totalorder %s335_s21, %s335_s21 }
   0xa   :  { %p342_p6 = por %p341_p5, %p340_p4 }
   0xc   :  { %p343_p7 = pnand %p342_p6, %p336_p3 }
   0xe   :  { %346 = shalt.err (!%p343_p7)
}
   0xf   :  { %s350_s22 = smov 64   ;;  %s351_s23 = smov 4  }
  0x10   :  { %22 = dma.hbm_to_vmem [thread:$0]  %s400_s1, 2048, %s17_s13, [#allocation3], %s350_s22, %s350_s22, %s351_s23  }
  0x11   :  { %347 = dma.done.wait [#allocation3], 2048  }
  0x12   :  { %348 = vsyncadd [#allocation3], 4294965248  ;;  %v298_v0 = vld [vmem:[#allocation2 + $0x40] sm:$0xff]   ;;  %v300_v2 = vld [vmem:[#allocation2 + $0x48] sm:$0xff]  }
  0x13   :  { %v299_v1 = vld [vmem:[#allocation2] sm:$0xff]   ;;  %273 = vmatprep.subr.bf16.mxu0 %v298_v0  ;;  %v301_v3 = vld [vmem:[#allocation2 + $0x8] sm:$0xff]   ;;  %v302_v4 = vld [vmem:[#allocation2 + $0x50] sm:$0xff]  }
  0x14   :  { %274 = vmatpush3.bf16.msra.mxu0 %v299_v1  ;;  %v303_v5 = vld [vmem:[#allocation2 + $0x10] sm:$0xff]   ;;  %v304_v6 = vld [vmem:[#allocation2 + $0x58] sm:$0xff]   ;;  %v306_v8 = vld [vmem:[#allocation2 + $0x60] sm:$0xff]  }
  0x15   :  { %275 = vmatprep.subr.bf16.mxu0 %v300_v2  ;;  %v305_v7 = vld [vmem:[#allocation2 + $0x18] sm:$0xff]   ;;  %v307_v9 = vld [vmem:[#allocation2 + $0x20] sm:$0xff]   ;;  %v308_v10 = vld [vmem:[#allocation2 + $0x68] sm:$0xff]  }
  0x16   :  { %v316_v11 = vld [vmem:[%s399_s0 + $0x4] ss:$8 sps:$4 sm:$0xff]   ;;  %v310_v13 = vld [vmem:[#allocation2 + $0x70] sm:$0xff]   ;;  %v312_v15 = vld [vmem:[#allocation2 + $0x78] sm:$0xff]  }
  0x17   :  { %v309_v12 = vld [vmem:[#allocation2 + $0x28] sm:$0xff]   ;;  %208 = vmatprep.mubr.bf16.mxu0 %v316_v11  ;;  %v311_v14 = vld [vmem:[#allocation2 + $0x30] sm:$0xff]   ;;  %v313_v16 = vld [vmem:[#allocation2 + $0x38] sm:$0xff]  }
  0x18   :  { %276 = vmatpush3.bf16.msra.mxu0 %v301_v3  ;;  %v314_v17 = vld [vmem:[%s399_s0] ss:$8 sps:$4 sm:$0xff]  }
  0x19   :  { %277 = vmatprep.subr.bf16.mxu0 %v302_v4  ;;  %v254_v19 = vld [vmem:[%s401_s2] ss:$0 sm:$0xff] }
  0x1c   :  { %278 = vmatpush3.bf16.msra.mxu0 %v303_v5 }
  0x1d   :  { %279 = vmatprep.subr.bf16.mxu0 %v304_v6 }
  0x20   :  { %280 = vmatpush3.bf16.msra.mxu0 %v305_v7 }
  0x21   :  { %281 = vmatprep.subr.bf16.mxu0 %v306_v8 }
  0x24   :  { %282 = vmatpush3.bf16.msra.mxu0 %v307_v9 }
  0x25   :  { %283 = vmatprep.subr.bf16.mxu0 %v308_v10 }
  0x28   :  { %284 = vmatpush3.bf16.msra.mxu0 %v309_v12 }
  0x29   :  { %285 = vmatprep.subr.bf16.mxu0 %v310_v13 }
  0x2c   :  { %286 = vmatpush3.bf16.msra.mxu0 %v311_v14 }
  0x2d   :  { %287 = vmatprep.subr.bf16.mxu0 %v312_v15 }
  0x30   :  { %288 = vmatpush3.bf16.msra.mxu0 %v313_v16 }
  0x33   :  { %209 = vmatmul.mubr.bf16.vlgmr.msra.gmra.mrb[0].mxu0 %v314_v17 }
 0x106   :  { %v289_v18 = vpop.f32.mrb[0].mxu0 }
 0x107   :  { %v290_v20 = vpop.f32.mrb[1].mxu0 }
 0x108   :  { %v291_v21 = vadd.f32 %v290_v20, %v289_v18  ;;  %v292_v22 = vpop.f32.mrb[2].mxu0 }
 0x109   :  { %v293_v23 = vpop.f32.mrb[3].mxu0 }
 0x10a   :  { %v211_v24 = vadd.f32 %v291_v21, %v254_v19  ;;  %v294_v25 = vadd.f32 %v293_v23, %v292_v22 }
 0x10c   :  { %v219_v26 = vand.u32 2147483647, %v211_v24  ;;  %v214_v27 = vadd.f32 %v294_v25, %v254_v19  ;;  %v217_v47 = vmax.f32 %v211_v24, 0.0 }
 0x10e   :  { %v221_v28 = vsub.f32 0.0, %v219_v26  ;;  %v220_v29 = vand.u32 2147483647, %v214_v27  ;;  %v218_v52 = vmax.f32 %v214_v27, 0.0 }
 0x110   :  { %v223_v30 = vmul.f32 1.442695, %v221_v28  ;;  %v222_v31 = vsub.f32 0.0, %v220_v29 }
 0x112   :  { %317 = vpow2.f32 %v223_v30  ;;  %v225_v32 = vmul.f32 1.442695, %v222_v31 }
 0x114   :  { %319 = vpow2.f32 %v225_v32 }
 0x11c   :  { %v318_v33 = vpop.eup %317 }
 0x11d   :  { %v227_v34 = vadd.f32 1.0, %v318_v33  ;;  %v230_v37 = vmul.f32 -0.5, %v318_v33  ;;  %v233_v40 = vand.u32 2147483647, %v318_v33 }
 0x11e   :  { %v320_v35 = vpop.eup %319 }
 0x11f   :  { %321 = vlog2.f32 %v227_v34  ;;  %v236_v36 = vadd.f32 1.0, %v320_v35  ;;  %v239_v38 = vmul.f32 -0.5, %v320_v35  ;;  %v231_v39 = vadd.f32 1.0, %v230_v37 }
 0x120   :  { %v242_v43 = vand.u32 2147483647, %v320_v35  ;;  %vm234_vm0 = vcmp.lt.f32.partialorder %v233_v40, 0.0004427343 }
 0x121   :  { %323 = vlog2.f32 %v236_v36  ;;  %v240_v41 = vadd.f32 1.0, %v239_v38  ;;  %v232_v45 = vmul.f32 %v318_v33, %v231_v39 }
 0x122   :  { %vm243_vm1 = vcmp.lt.f32.partialorder %v242_v43, 0.0004427343 }
 0x123   :  { %v241_v50 = vmul.f32 %v320_v35, %v240_v41 }
 0x129   :  { %v322_v42 = vpop.eup %321 }
 0x12a   :  { %v229_v44 = vmul.f32 0.6931472, %v322_v42 }
 0x12b   :  { %v324_v46 = vpop.eup %323 }
 0x12c   :  { %v235_v48 = vsel %vm234_vm0, %v232_v45, %v229_v44  ;;  %v238_v49 = vmul.f32 0.6931472, %v324_v46 }
 0x12d   :  { %v245_v51 = vadd.f32 %v235_v48, %v217_v47 }
 0x12e   :  { %v244_v53 = vsel %vm243_vm1, %v241_v50, %v238_v49 }
 0x12f   :  { %247 = vst [vmem:[%s402_s3] sm:$0xff] %v245_v51  ;;  %v246_v54 = vadd.f32 %v244_v53, %v218_v52 }
 0x131   :  { %248 = vst [vmem:[%s402_s3 + $0x8] sm:$0xff] %v246_v54 }
 0x132   :  { %253 = vsyncpa [#allocation3], 1 }

</bundles_post_ra>
